<compile_context>
chip_gen: v6e
topology: v6e:2x2x1
jax: 0.10.0
libtpu: 0.0.40
codegen_flags: <defaults>
</compile_context>

<pallas_src>
import functools

import numpy as np
import jax
import jax.numpy as jnp
from jax.experimental import pallas as pl
from jax.experimental.pallas import tpu as pltpu

PI = np.pi


# --------------------------------------------------------------------------
# Kernel: one Karatsuba complex matmul + fused |x|^2
# --------------------------------------------------------------------------
def generator_kernel(xr_ref, xi_ref, wr_ref, wi_ref, ws_ref, out_ref,
                     *, use_bf16=False):
    """out = |(xr + i*xi) @ (wr + i*wi)|^2 ; ws = wr + wi (hoisted)."""
    mat_dtype = jnp.bfloat16 if use_bf16 else jnp.float32

    xr = xr_ref[...]
    xi = xi_ref[...]
    ar = xr.astype(mat_dtype)
    ai = xi.astype(mat_dtype)
    asum = (xr + xi).astype(mat_dtype)

    wr = wr_ref[...].astype(mat_dtype)
    wi = wi_ref[...].astype(mat_dtype)
    ws = ws_ref[...].astype(mat_dtype)

    # Karatsuba: (a + i b)(c + i d) -> p1 = ac, p2 = bd, p3 = (a+b)(c+d)
    p1 = jnp.dot(ar, wr, preferred_element_type=jnp.float32)
    p2 = jnp.dot(ai, wi, preferred_element_type=jnp.float32)
    p3 = jnp.dot(asum, ws, preferred_element_type=jnp.float32)
    yr = p1 - p2
    yi = p3 - p1 - p2

    # intensity |y|^2, fused directly onto the matmul result (lane-dense store)
    out_ref[...] = yr * yr + yi * yi


# --------------------------------------------------------------------------
# Host-side helpers
# --------------------------------------------------------------------------
def _transfer_function(real_size, row, col, distance, wave_length):
    """Band-limited angular-spectrum transfer function (complex128)."""
    fy = np.fft.fftfreq(row, d=real_size / row)
    fx = np.fft.fftfreq(col, d=real_size / col)
    FY, FX = np.meshgrid(fy, fx, indexing="ij")
    arg = (1.0 / wave_length) ** 2 - FX ** 2 - FY ** 2
    mask = arg > 0
    phase = 2.0 * PI * distance * np.sqrt(np.maximum(arg, 0.0))
    return np.where(mask, np.exp(1j * phase), 0.0 + 0.0j).astype(np.complex128)


def _vmem_capacity_bytes():
    """Per-TensorCore VMEM capacity; conservative (v7x) fallback."""
    try:
        info = pltpu.get_tpu_info()
        cap = getattr(info, "vmem_capacity_bytes", None)
        if cap:
            return int(cap)
    except Exception:
        pass
    return 64 << 20   # v7x per-TC VMEM (smallest of v5e/v6e/v7x)


def _pick_batch_tile(bc, n, vmem_cap_bytes):
    """Flattened-image rows per grid step.

    Single-TC chips (v5e/v6e) want the whole batch in one step; the budget is
    sized so I/O blocks + Karatsuba intermediates stay well under ~1/4 VMEM,
    leaving the rest for the resident operator and pipeline buffers.
    Non-full tiles must keep the sublane dim a multiple of 8.
    """
    row_bytes = n * 4
    budget = vmem_cap_bytes // 4
    max_rows = max(1, budget // (row_bytes * 10))   # ~10 live f32 rows / image
    if bc <= max_rows:
        return bc
    fitting, any_valid = [], []
    for d in range(8, bc, 8):
        if bc % d == 0:
            any_valid.append(d)
            if d <= max_rows:
                fitting.append(d)
    if fitting:
        return max(fitting)
    if any_valid:
        return min(any_valid)
    return bc                                       # no valid split; use full batch


# --------------------------------------------------------------------------
# Generator
# --------------------------------------------------------------------------
class GeneratorPallas:
    def __init__(self, real_size, in_distance, layer_interval, out_distance,
                 wave_length, row, col, key, use_bf16=False):
        self.row, self.col = row, col
        self.use_bf16 = use_bf16
        N = row * col

        # PhaseLayer weights (deterministic stand-in for torch.randn params).
        k1, k2, k3 = jax.random.split(key, 3)
        w_np = [np.asarray(jax.random.normal(k, (row, col), jnp.float32),
                           dtype=np.float64) for k in (k1, k2, k3)]
        # exp(i * 2*pi * sigmoid(W))
        Ts = [np.exp(1j * 2.0 * PI / (1.0 + np.exp(-w))) for w in w_np]

        # Angular-spectrum transfer functions for the 4 propagation distances.
        H1 = _transfer_function(real_size, row, col, in_distance, wave_length)
        H2 = _transfer_function(real_size, row, col, layer_interval, wave_length)
        H3 = _transfer_function(real_size, row, col, out_distance, wave_length)
        Hs = [H1, H2, H2, H3]

        # Kept (complex64) only for the pure-JAX fft2 reference.
        self.H = jnp.asarray(np.stack(Hs).astype(np.complex64))
        self.T = jnp.asarray(np.stack(Ts).astype(np.complex64))

        # ----- fused network operator ------------------------------------
        # Everything before |x|^2 is linear in the input field, so compose
        # prop(in_d) -> T1 -> prop(layer) -> T2 -> prop(layer) -> T3 ->
        # prop(out_d) into one (R*C)x(R*C) complex matrix W such that
        # y_flat = x_flat @ W  (row-major flattening, row-vector action).
        op_bytes = 3 * N * N * 4                   # wr, wi, ws as f32
        if op_bytes > _vmem_capacity_bytes() // 3:
            # TODO(synk): stream per-step operators / per-step 2-D DFT matmuls
            # when the fused operator exceeds the VMEM budget.
            raise NotImplementedError(
                "Fused (R*C)^2 operator does not fit VMEM at this (row, col); "
                "per-step streamed fallback not implemented.")

        X = np.eye(N, dtype=np.complex128).reshape(N, row, col)
        for step in range(4):
            F = np.fft.fft2(X, axes=(-2, -1))
            F = F * Hs[step]
            X = np.fft.ifft2(F, axes=(-2, -1))
            if step < 3:
                X = X * Ts[step]
        W = X.reshape(N, N)                        # rows: image of basis vectors

        self.w_re = jnp.asarray(np.real(W).astype(np.float32))
        self.w_im = jnp.asarray(np.imag(W).astype(np.float32))
        self.w_sum = self.w_re + self.w_im         # hoisted Karatsuba sum

    def __call__(self, x):
        """x: complex64 (B, Cch, R, C) -> float32 intensity (B, Cch, R, C)."""
        B, Cch, R, C = x.shape
        assert (R, C) == (self.row, self.col)
        BC = B * Cch
        N = R * C

        # Lane-dense layout: one flattened row per image (N = 256 = 2*128).
        xr = jnp.real(x).reshape(BC, N).astype(jnp.float32)
        xi = jnp.imag(x).reshape(BC, N).astype(jnp.float32)

        vmem_cap = _vmem_capacity_bytes()
        bt = _pick_batch_tile(BC, N, vmem_cap)
        grid = (BC // bt,)

        img_spec = pl.BlockSpec((bt, N), lambda i: (i, 0))
        w_spec = pl.BlockSpec((N, N), lambda i: (0, 0))
        # NOTE: the constant-index operator blocks are DMA'd once per grid step;
        # with the fused operator the grid is usually a single step, so default
        # double-buffering costs <1 MiB here (see TODO for large R*C streaming).

        # Generation-aware VMEM budget: double-buffered operator + I/O blocks
        # + Karatsuba intermediates, capped at 60% of this chip's VMEM.
        row_bytes = N * 4
        const_bytes = 3 * N * N * 4
        io_bytes = 3 * bt * row_bytes
        est = 2 * (const_bytes + io_bytes) + 8 * bt * row_bytes
        vmem_limit = int(min(max(2 * est, 16 << 20), int(0.6 * vmem_cap)))
        vmem_limit = max(vmem_limit, est)

        kernel = functools.partial(generator_kernel, use_bf16=self.use_bf16)

        out = pl.pallas_call(
            kernel,
            out_shape=jax.ShapeDtypeStruct((BC, N), jnp.float32),
            grid=grid,
            in_specs=[img_spec, img_spec, w_spec, w_spec, w_spec],
            out_specs=img_spec,
            compiler_params=pltpu.CompilerParams(
                dimension_semantics=("parallel",),
                vmem_limit_bytes=vmem_limit),
        )(xr, xi, self.w_re, self.w_im, self.w_sum)

        return out.reshape(B, Cch, R, C)

    def reference(self, x):
        """Pure-JAX reference using per-step fft2 (numerical cross-check)."""
        for step in range(4):
            X = jnp.fft.fft2(x)
            X = X * self.H[step]
            x = jnp.fft.ifft2(X)
            if step < 3:
                x = x * self.T[step]
        return (jnp.abs(x) ** 2).astype(jnp.float32)


if __name__ == "__main__":
    key = jax.random.PRNGKey(0)
    k_param, k_x = jax.random.split(key)

    # small, physically-plausible setup
    B, Cch, R, C = 2, 4, 16, 16
    real_size = 2e-3          # 2 mm aperture
    wave_length = 632.8e-9    # HeNe
    in_distance = 0.05
    layer_interval = 0.03
    out_distance = 0.05

    gen = GeneratorPallas(real_size, in_distance, layer_interval, out_distance,
                          wave_length, R, C, k_param, use_bf16=False)

    # real-valued input field (imag part = 0)
    x_real = jax.random.normal(k_x, (B, Cch, R, C), jnp.float32)
    x = x_real.astype(jnp.complex64)

    out = jax.block_until_ready(gen(x))
    ref = jax.block_until_ready(gen.reference(x))
    np.testing.assert_allclose(np.asarray(out), np.asarray(ref),
                               rtol=1e-2, atol=1e-2)

    print("KERNEL_OK")
</pallas_src>

<mosaic_0001>
module attributes {stable_mosaic.version = 11 : i64} {
  func.func @generator_kernel(%arg0: i32, %arg1: memref<8x256xf32, #tpu.memory_space<vmem>>, %arg2: memref<8x256xf32, #tpu.memory_space<vmem>>, %arg3: memref<256x256xf32, #tpu.memory_space<vmem>>, %arg4: memref<256x256xf32, #tpu.memory_space<vmem>>, %arg5: memref<256x256xf32, #tpu.memory_space<vmem>>, %arg6: memref<8x256xf32, #tpu.memory_space<vmem>>) attributes {dimension_semantics = [#tpu.dimension_semantics<parallel>], iteration_bounds = array<i64: 1>, scalar_prefetch = 0 : i64, scratch_operands = 0 : i64, tpu.core_type = #tpu.core_type<tc>, window_params = [{transform_indices = @transform_0, window_bounds = array<i64: 8, 256>}, {transform_indices = @transform_1, window_bounds = array<i64: 8, 256>}, {pipeline_mode = #tpu.pipeline_mode<synchronous>, transform_indices = @transform_2, window_bounds = array<i64: 256, 256>}, {pipeline_mode = #tpu.pipeline_mode<synchronous>, transform_indices = @transform_3, window_bounds = array<i64: 256, 256>}, {pipeline_mode = #tpu.pipeline_mode<synchronous>, transform_indices = @transform_4, window_bounds = array<i64: 256, 256>}, {transform_indices = @transform_5, window_bounds = array<i64: 8, 256>}]} {
    %c0 = arith.constant 0 : index
    %c0_0 = arith.constant 0 : index
    %0 = vector.load %arg1[%c0, %c0_0] : memref<8x256xf32, #tpu.memory_space<vmem>>, vector<8x256xf32>
    %c0_1 = arith.constant 0 : index
    %c0_2 = arith.constant 0 : index
    %1 = vector.load %arg2[%c0_1, %c0_2] : memref<8x256xf32, #tpu.memory_space<vmem>>, vector<8x256xf32>
    %2 = arith.addf %0, %1 : vector<8x256xf32>
    %c0_3 = arith.constant 0 : index
    %c0_4 = arith.constant 0 : index
    %3 = vector.load %arg3[%c0_3, %c0_4] : memref<256x256xf32, #tpu.memory_space<vmem>>, vector<256x256xf32>
    %c0_5 = arith.constant 0 : index
    %c0_6 = arith.constant 0 : index
    %4 = vector.load %arg4[%c0_5, %c0_6] : memref<256x256xf32, #tpu.memory_space<vmem>>, vector<256x256xf32>
    %c0_7 = arith.constant 0 : index
    %c0_8 = arith.constant 0 : index
    %5 = vector.load %arg5[%c0_7, %c0_8] : memref<256x256xf32, #tpu.memory_space<vmem>>, vector<256x256xf32>
    %cst = arith.constant dense<0.000000e+00> : vector<8x256xf32>
    %6 = tpu.matmul %0, %3, %cst {dimension_numbers = #tpu.dot_dimension_numbers<[1], [0], [0], [1], [0, 0, 1, 1], [], []>} : vector<8x256xf32>, vector<256x256xf32>, vector<8x256xf32> -> vector<8x256xf32>
    %cst_9 = arith.constant dense<0.000000e+00> : vector<8x256xf32>
    %7 = tpu.matmul %1, %4, %cst_9 {dimension_numbers = #tpu.dot_dimension_numbers<[1], [0], [0], [1], [0, 0, 1, 1], [], []>} : vector<8x256xf32>, vector<256x256xf32>, vector<8x256xf32> -> vector<8x256xf32>
    %cst_10 = arith.constant dense<0.000000e+00> : vector<8x256xf32>
    %8 = tpu.matmul %2, %5, %cst_10 {dimension_numbers = #tpu.dot_dimension_numbers<[1], [0], [0], [1], [0, 0, 1, 1], [], []>} : vector<8x256xf32>, vector<256x256xf32>, vector<8x256xf32> -> vector<8x256xf32>
    %9 = arith.subf %6, %7 : vector<8x256xf32>
    %10 = arith.subf %8, %6 : vector<8x256xf32>
    %11 = arith.subf %10, %7 : vector<8x256xf32>
    %12 = arith.mulf %9, %9 : vector<8x256xf32>
    %13 = arith.mulf %11, %11 : vector<8x256xf32>
    %14 = arith.addf %12, %13 : vector<8x256xf32>
    %c0_11 = arith.constant 0 : index
    %c0_12 = arith.constant 0 : index
    %15 = vector.load %arg6[%c0_11, %c0_12] : memref<8x256xf32, #tpu.memory_space<vmem>>, vector<8x256xf32>
    tpu.vector_store %arg6[%c0_11, %c0_12], %14 {strides = array<i32>} : memref<8x256xf32, #tpu.memory_space<vmem>>, vector<8x256xf32>,
    return
  }
  func.func @transform_0(%arg0: i32) -> (i32, i32) {
    %c0_i32 = arith.constant 0 : i32
    %c0_i32_0 = arith.constant 0 : i32
    return %arg0, %c0_i32 : i32, i32
  }
  func.func @transform_1(%arg0: i32) -> (i32, i32) {
    %c0_i32 = arith.constant 0 : i32
    %c0_i32_0 = arith.constant 0 : i32
    return %arg0, %c0_i32 : i32, i32
  }
  func.func @transform_2(%arg0: i32) -> (i32, i32) {
    %c0_i32 = arith.constant 0 : i32
    %c0_i32_0 = arith.constant 0 : i32
    %c0_i32_1 = arith.constant 0 : i32
    return %c0_i32, %c0_i32_0 : i32, i32
  }
  func.func @transform_3(%arg0: i32) -> (i32, i32) {
    %c0_i32 = arith.constant 0 : i32
    %c0_i32_0 = arith.constant 0 : i32
    %c0_i32_1 = arith.constant 0 : i32
    return %c0_i32, %c0_i32_0 : i32, i32
  }
  func.func @transform_4(%arg0: i32) -> (i32, i32) {
    %c0_i32 = arith.constant 0 : i32
    %c0_i32_0 = arith.constant 0 : i32
    %c0_i32_1 = arith.constant 0 : i32
    return %c0_i32, %c0_i32_0 : i32, i32
  }
  func.func @transform_5(%arg0: i32) -> (i32, i32) {
    %c0_i32 = arith.constant 0 : i32
    %c0_i32_0 = arith.constant 0 : i32
    return %arg0, %c0_i32 : i32, i32
  }
}

</mosaic_0001>

<bundles_post_ra>
// kernel: tpu_custom_call.1
= control target key start
LH: loop header
LB: loop body
LE: loop exit
PB: predicated region body
PF: predicated region fallthrough
CT: control target
= control target key end

     0   :  { %10 = vsyncpa [#allocation3], 0  ;;  %s736_s0 = inlined_call_operand.hbm [shape: f32[8,256], index: 0, kind: input, shape index: {}]   ;;  %s737_s1 = inlined_call_operand.hbm [shape: f32[8,256], index: 1, kind: input, shape index: {}]   ;;  %s738_s2 = inlined_call_operand.hbm [shape: f32[256,256], index: 2, kind: input, shape index: {}]   ;;  %s739_s3 = inlined_call_operand.hbm [shape: f32[256,256], index: 3, kind: input, shape index: {}]   ;;  %s740_s4 = inlined_call_operand.hbm [shape: f32[256,256], index: 4, kind: input, shape index: {}]   ;;  %s741_s5 = inlined_call_operand.hbm [shape: f32[8,256], index: 5, kind: output, shape index: {}]  }
   0x1   :  { %11 = vsyncpa [#allocation6], 0 }
   0x2   :  { %12 = vsyncpa [#allocation9], 0 }
   0x3   :  { %13 = vsyncpa [#allocation4], 0  ;;  %s663_s18 = smov [#allocation5]  }
   0x4   :  { %s30_s19 = sshll.u32 %s663_s18, 4  ;;  %s31_s19 = int_to_ptr.vmem [resolvable:$true] %s30_s19 }
   0x5   :  { %s543_s20 = scalar_lea.vmem %s31_s19, 256  ;;  %p548_p1 = scmp.lt.s32.totalorder %s31_s19, %s31_s19 }
   0x6   :  { %p544_p0 = scmp.ne.s32.totalorder %s31_s19, %s543_s20  ;;  %p549_p2 = scmp.lt.s32.totalorder %s543_s20, %s543_s20 }
   0x8   :  { %p550_p3 = por %p549_p2, %p548_p1 }
   0xa   :  { %p551_p4 = pnand %p550_p3, %p544_p0 }
   0xc   :  { %554 = shalt.err (!%p551_p4)
}
   0xd   :  { %33 = dma.hbm_to_vmem [thread:$0]  %s737_s1, 256, %s31_s19, [#allocation6]  }
   0xe   :  { %s664_s23 = smov [#allocation8]   ;;  %s665_s25 = smov [#allocation2]  }
   0xf   :  { %s51_s24 = sshll.u32 %s664_s23, 4  ;;  %s20_s26 = sshll.u32 %s665_s25, 4  ;;  %s52_s24 = int_to_ptr.vmem [resolvable:$true] %s51_s24  ;;  %s21_s26 = int_to_ptr.vmem [resolvable:$true] %s20_s26 }
  0x10   :  { %s563_s27 = scalar_lea.vmem %s52_s24, 8192  ;;  %p568_p6 = scmp.lt.s32.totalorder %s52_s24, %s52_s24 }
  0x11   :  { %p564_p5 = scmp.ne.s32.totalorder %s52_s24, %s563_s27  ;;  %p569_p7 = scmp.lt.s32.totalorder %s563_s27, %s563_s27 }
  0x13   :  { %p570_p8 = por %p569_p7, %p568_p6 }
  0x15   :  { %p571_p9 = pnand %p570_p8, %p564_p5 }
  0x17   :  { %574 = shalt.err (!%p571_p9)
}
  0x18   :  { %s666_s28 = smov 256   ;;  %s667_s29 = smov 16  }
  0x19   :  { %57 = dma.hbm_to_vmem [thread:$0]  %s739_s3, 8192, %s52_s24, [#allocation9], %s666_s28, %s666_s28, %s667_s29  }
  0x1a   :  { %s583_s1 = scalar_lea.vmem %s21_s26, 256  ;;  %p588_p11 = scmp.lt.s32.totalorder %s21_s26, %s21_s26 }
  0x1b   :  { %p584_p10 = scmp.ne.s32.totalorder %s21_s26, %s583_s1  ;;  %p589_p12 = scmp.lt.s32.totalorder %s583_s1, %s583_s1 }
  0x1d   :  { %p590_p13 = por %p589_p12, %p588_p11 }
  0x1f   :  { %p591_p0 = pnand %p590_p13, %p584_p10 }
  0x21   :  { %594 = shalt.err (!%p591_p0)
}
  0x22   :  { %23 = dma.hbm_to_vmem [thread:$0]  %s736_s0, 256, %s21_s26, [#allocation3]  }
  0x23   :  { %s668_s9 = smov [#allocation7]   ;;  %s669_s11 = smov [#allocation10]  }
  0x24   :  { %s39_s10 = sshll.u32 %s668_s9, 4  ;;  %s63_s12 = sshll.u32 %s669_s11, 4  ;;  %s40_s10 = int_to_ptr.vmem [resolvable:$true] %s39_s10  ;;  %s64_s12 = int_to_ptr.vmem [resolvable:$true] %s63_s12 }
  0x25   :  { %s603_s13 = scalar_lea.vmem %s40_s10, 8192  ;;  %p608_p2 = scmp.lt.s32.totalorder %s40_s10, %s40_s10 }
  0x26   :  { %p604_p1 = scmp.ne.s32.totalorder %s40_s10, %s603_s13  ;;  %p609_p3 = scmp.lt.s32.totalorder %s603_s13, %s603_s13 }
  0x28   :  { %p610_p4 = por %p609_p3, %p608_p2 }
  0x2a   :  { %p611_p5 = pnand %p610_p4, %p604_p1 }
  0x2c   :  { %614 = shalt.err (!%p611_p5)
}
  0x2d   :  { %45 = dma.hbm_to_vmem [thread:$0]  %s738_s2, 8192, %s40_s10, [#allocation6], %s666_s28, %s666_s28, %s667_s29  }
  0x2e   :  { %s623_s0 = scalar_lea.vmem %s64_s12, 8192  ;;  %p628_p7 = scmp.lt.s32.totalorder %s64_s12, %s64_s12 }
  0x2f   :  { %p624_p6 = scmp.ne.s32.totalorder %s64_s12, %s623_s0  ;;  %p629_p8 = scmp.lt.s32.totalorder %s623_s0, %s623_s0 }
  0x31   :  { %p630_p9 = por %p629_p8, %p628_p7 }
  0x33   :  { %p631_p10 = pnand %p630_p9, %p624_p6 }
  0x35   :  { %634 = shalt.err (!%p631_p10)
}
  0x36   :  { %69 = dma.hbm_to_vmem [thread:$0]  %s740_s4, 8192, %s64_s12, [#allocation9], %s666_s28, %s666_s28, %s667_s29  }
  0x37   :  { %655 = dma.done.wait [#allocation3], 256  }
  0x38   :  { %656 = vsyncadd [#allocation3], 4294967040 }
  0x39   :  { %657 = dma.done.wait [#allocation6], 8448  }
  0x3a   :  { %658 = vsyncadd [#allocation6], 4294958848 }
  0x3b   :  { %659 = dma.done.wait [#allocation9], 16384  }
  0x3c   :  { %660 = vsyncadd [#allocation9], 4294950912  ;;  %v122_v0 = vld [vmem:[#allocation7 + $0xf8] sm:$0xff]  ;;  %v121_v2 = vld [vmem:[#allocation7 + $0xf0] sm:$0xff]  ;;  %s670_s2 = smov [#allocation11]  }
  0x3d   :  { %v186_v1 = vld [vmem:[#allocation8 + $0xf8] sm:$0xff]  ;;  %283 = vmatprep.subr.mxu0 %v122_v0  ;;  %v185_v3 = vld [vmem:[#allocation8 + $0xf0] sm:$0xff]  ;;  %v120_v4 = vld [vmem:[#allocation7 + $0xe8] sm:$0xff]  ;;  %s516_s4 = sshll.u32 %s670_s2, 4  ;;  %s517_s4 = int_to_ptr.vmem [resolvable:$true] %s516_s4 }
  0x3e   :  { %354 = vmatprep.subr.mxu1 %v186_v1  ;;  %v184_v5 = vld [vmem:[#allocation8 + $0xe8] sm:$0xff]  ;;  %284 = vmatpush1.msra.mxu0 %v121_v2  ;;  %v119_v6 = vld [vmem:[#allocation7 + $0xe0] sm:$0xff]  ;;  %v118_v8 = vld [vmem:[#allocation7 + $0xd8] sm:$0xff]  ;;  %s635_s17 = scalar_lea.vmem %s517_s4, 256  ;;  %p640_p12 = scmp.lt.s32.totalorder %s517_s4, %s517_s4 }
  0x3f   :  { %355 = vmatpush1.msra.mxu1 %v185_v3  ;;  %v183_v7 = vld [vmem:[#allocation8 + $0xe0] sm:$0xff]  ;;  %285 = vmatprep.subr.mxu0 %v120_v4  ;;  %v182_v9 = vld [vmem:[#allocation8 + $0xd8] sm:$0xff]  ;;  %v117_v10 = vld [vmem:[#allocation7 + $0xd0] sm:$0xff]  ;;  %p636_p11 = scmp.ne.s32.totalorder %s517_s4, %s635_s17  ;;  %p641_p13 = scmp.lt.s32.totalorder %s635_s17, %s635_s17 }
  0x40   :  { %356 = vmatprep.subr.mxu1 %v184_v5  ;;  %v181_v11 = vld [vmem:[#allocation8 + $0xd0] sm:$0xff]  ;;  %286 = vmatpush1.msra.mxu0 %v119_v6  ;;  %v116_v12 = vld [vmem:[#allocation7 + $0xc8] sm:$0xff]  ;;  %v115_v14 = vld [vmem:[#allocation7 + $0xc0] sm:$0xff] }
  0x41   :  { %357 = vmatpush1.msra.mxu1 %v183_v7  ;;  %v180_v13 = vld [vmem:[#allocation8 + $0xc8] sm:$0xff]  ;;  %287 = vmatprep.subr.mxu0 %v118_v8  ;;  %v179_v15 = vld [vmem:[#allocation8 + $0xc0] sm:$0xff]  ;;  %v114_v16 = vld [vmem:[#allocation7 + $0xb8] sm:$0xff]  ;;  %p642_p0 = por %p641_p13, %p640_p12 }
  0x42   :  { %358 = vmatprep.subr.mxu1 %v182_v9  ;;  %288 = vmatpush1.msra.mxu0 %v117_v10  ;;  %v178_v17 = vld [vmem:[#allocation8 + $0xb8] sm:$0xff]  ;;  %v113_v18 = vld [vmem:[#allocation7 + $0xb0] sm:$0xff]  ;;  %v112_v20 = vld [vmem:[#allocation7 + $0xa8] sm:$0xff] }
  0x43   :  { %359 = vmatpush1.msra.mxu1 %v181_v11  ;;  %289 = vmatprep.subr.mxu0 %v116_v12  ;;  %v177_v19 = vld [vmem:[#allocation8 + $0xb0] sm:$0xff]  ;;  %v176_v21 = vld [vmem:[#allocation8 + $0xa8] sm:$0xff]  ;;  %v111_v22 = vld [vmem:[#allocation7 + $0xa0] sm:$0xff]  ;;  %p643_p1 = pnand %p642_p0, %p636_p11 }
  0x44   :  { %360 = vmatprep.subr.mxu1 %v180_v13  ;;  %290 = vmatpush1.msra.mxu0 %v115_v14  ;;  %v175_v23 = vld [vmem:[#allocation8 + $0xa0] sm:$0xff]  ;;  %v110_v24 = vld [vmem:[#allocation7 + $0x98] sm:$0xff]  ;;  %v109_v26 = vld [vmem:[#allocation7 + $0x90] sm:$0xff] }
  0x45   :  { %361 = vmatpush1.msra.mxu1 %v179_v15  ;;  %291 = vmatprep.subr.mxu0 %v114_v16  ;;  %v174_v25 = vld [vmem:[#allocation8 + $0x98] sm:$0xff]  ;;  %v173_v27 = vld [vmem:[#allocation8 + $0x90] sm:$0xff]  ;;  %v108_v28 = vld [vmem:[#allocation7 + $0x88] sm:$0xff] }
  0x46   :  { %362 = vmatprep.subr.mxu1 %v178_v17  ;;  %292 = vmatpush1.msra.mxu0 %v113_v18  ;;  %v172_v29 = vld [vmem:[#allocation8 + $0x88] sm:$0xff]  ;;  %v107_v30 = vld [vmem:[#allocation7 + $0x80] sm:$0xff]  ;;  %v106_v32 = vld [vmem:[#allocation7 + $0x78] sm:$0xff] }
  0x47   :  { %363 = vmatpush1.msra.mxu1 %v177_v19  ;;  %293 = vmatprep.subr.mxu0 %v112_v20  ;;  %v171_v31 = vld [vmem:[#allocation8 + $0x80] sm:$0xff]  ;;  %v170_v33 = vld [vmem:[#allocation8 + $0x78] sm:$0xff]  ;;  %v105_v34 = vld [vmem:[#allocation7 + $0x70] sm:$0xff] }
  0x48   :  { %364 = vmatprep.subr.mxu1 %v176_v21  ;;  %294 = vmatpush1.msra.mxu0 %v111_v22  ;;  %v169_v35 = vld [vmem:[#allocation8 + $0x70] sm:$0xff]  ;;  %v104_v36 = vld [vmem:[#allocation7 + $0x68] sm:$0xff]  ;;  %v103_v38 = vld [vmem:[#allocation7 + $0x60] sm:$0xff] }
  0x49   :  { %365 = vmatpush1.msra.mxu1 %v175_v23  ;;  %295 = vmatprep.subr.mxu0 %v110_v24  ;;  %v168_v37 = vld [vmem:[#allocation8 + $0x68] sm:$0xff]  ;;  %v167_v39 = vld [vmem:[#allocation8 + $0x60] sm:$0xff]  ;;  %v102_v40 = vld [vmem:[#allocation7 + $0x58] sm:$0xff] }
  0x4a   :  { %366 = vmatprep.subr.mxu1 %v174_v25  ;;  %296 = vmatpush1.msra.mxu0 %v109_v26  ;;  %v166_v41 = vld [vmem:[#allocation8 + $0x58] sm:$0xff]  ;;  %v101_v42 = vld [vmem:[#allocation7 + $0x50] sm:$0xff]  ;;  %v100_v44 = vld [vmem:[#allocation7 + $0x48] sm:$0xff] }
  0x4b   :  { %367 = vmatpush1.msra.mxu1 %v173_v27  ;;  %297 = vmatprep.subr.mxu0 %v108_v28  ;;  %v165_v43 = vld [vmem:[#allocation8 + $0x50] sm:$0xff]  ;;  %v164_v45 = vld [vmem:[#allocation8 + $0x48] sm:$0xff]  ;;  %v99_v46 = vld [vmem:[#allocation7 + $0x40] sm:$0xff] }
  0x4c   :  { %368 = vmatprep.subr.mxu1 %v172_v29  ;;  %298 = vmatpush1.msra.mxu0 %v107_v30  ;;  %v163_v47 = vld [vmem:[#allocation8 + $0x40] sm:$0xff]  ;;  %v98_v48 = vld [vmem:[#allocation7 + $0x38] sm:$0xff]  ;;  %v97_v50 = vld [vmem:[#allocation7 + $0x30] sm:$0xff] }
  0x4d   :  { %369 = vmatpush1.msra.mxu1 %v171_v31  ;;  %299 = vmatprep.subr.mxu0 %v106_v32  ;;  %v162_v49 = vld [vmem:[#allocation8 + $0x38] sm:$0xff]  ;;  %v161_v51 = vld [vmem:[#allocation8 + $0x30] sm:$0xff]  ;;  %v96_v52 = vld [vmem:[#allocation7 + $0x28] sm:$0xff] }
  0x4e   :  { %370 = vmatprep.subr.mxu1 %v170_v33  ;;  %300 = vmatpush1.msra.mxu0 %v105_v34  ;;  %v160_v53 = vld [vmem:[#allocation8 + $0x28] sm:$0xff]  ;;  %v95_v54 = vld [vmem:[#allocation7 + $0x20] sm:$0xff]  ;;  %v94_v56 = vld [vmem:[#allocation7 + $0x18] sm:$0xff] }
  0x4f   :  { %371 = vmatpush1.msra.mxu1 %v169_v35  ;;  %301 = vmatprep.subr.mxu0 %v104_v36  ;;  %v159_v55 = vld [vmem:[#allocation8 + $0x20] sm:$0xff]  ;;  %v158_v57 = vld [vmem:[#allocation8 + $0x18] sm:$0xff]  ;;  %v93_v58 = vld [vmem:[#allocation7 + $0x10] sm:$0xff] }
  0x50   :  { %372 = vmatprep.subr.mxu1 %v168_v37  ;;  %302 = vmatpush1.msra.mxu0 %v103_v38  ;;  %v157_v59 = vld [vmem:[#allocation8 + $0x10] sm:$0xff]  ;;  %v92_v60 = vld [vmem:[#allocation7 + $0x8] sm:$0xff]  ;;  %v91_v62 = vld [vmem:[#allocation7] sm:$0xff] }
  0x51   :  { %373 = vmatpush1.msra.mxu1 %v167_v39  ;;  %303 = vmatprep.subr.mxu0 %v102_v40  ;;  %v156_v61 = vld [vmem:[#allocation8 + $0x8] sm:$0xff]  ;;  %v155_v63 = vld [vmem:[#allocation8] sm:$0xff]  ;;  %v154_v0 = vld [vmem:[#allocation7 + $0x1f8] sm:$0xff] }
  0x52   :  { %374 = vmatprep.subr.mxu1 %v166_v41  ;;  %304 = vmatpush1.msra.mxu0 %v101_v42  ;;  %v218_v1 = vld [vmem:[#allocation8 + $0x1f8] sm:$0xff]  ;;  %v153_v2 = vld [vmem:[#allocation7 + $0x1f0] sm:$0xff]  ;;  %v152_v4 = vld [vmem:[#allocation7 + $0x1e8] sm:$0xff] }
  0x53   :  { %375 = vmatpush1.msra.mxu1 %v165_v43  ;;  %305 = vmatprep.subr.mxu0 %v100_v44  ;;  %v217_v3 = vld [vmem:[#allocation8 + $0x1f0] sm:$0xff]  ;;  %v216_v5 = vld [vmem:[#allocation8 + $0x1e8] sm:$0xff]  ;;  %v151_v6 = vld [vmem:[#allocation7 + $0x1e0] sm:$0xff] }
  0x54   :  { %376 = vmatprep.subr.mxu1 %v164_v45  ;;  %306 = vmatpush1.msra.mxu0 %v99_v46  ;;  %v215_v7 = vld [vmem:[#allocation8 + $0x1e0] sm:$0xff]  ;;  %v150_v8 = vld [vmem:[#allocation7 + $0x1d8] sm:$0xff]  ;;  %v149_v10 = vld [vmem:[#allocation7 + $0x1d0] sm:$0xff] }
  0x55   :  { %377 = vmatpush1.msra.mxu1 %v163_v47  ;;  %307 = vmatprep.subr.mxu0 %v98_v48  ;;  %v214_v9 = vld [vmem:[#allocation8 + $0x1d8] sm:$0xff]  ;;  %v213_v11 = vld [vmem:[#allocation8 + $0x1d0] sm:$0xff]  ;;  %v148_v12 = vld [vmem:[#allocation7 + $0x1c8] sm:$0xff] }
  0x56   :  { %378 = vmatprep.subr.mxu1 %v162_v49  ;;  %308 = vmatpush1.msra.mxu0 %v97_v50  ;;  %v212_v13 = vld [vmem:[#allocation8 + $0x1c8] sm:$0xff]  ;;  %v147_v14 = vld [vmem:[#allocation7 + $0x1c0] sm:$0xff]  ;;  %v146_v16 = vld [vmem:[#allocation7 + $0x1b8] sm:$0xff] }
  0x57   :  { %379 = vmatpush1.msra.mxu1 %v161_v51  ;;  %309 = vmatprep.subr.mxu0 %v96_v52  ;;  %v211_v15 = vld [vmem:[#allocation8 + $0x1c0] sm:$0xff]  ;;  %v210_v17 = vld [vmem:[#allocation8 + $0x1b8] sm:$0xff]  ;;  %v145_v18 = vld [vmem:[#allocation7 + $0x1b0] sm:$0xff] }
  0x58   :  { %380 = vmatprep.subr.mxu1 %v160_v53  ;;  %310 = vmatpush1.msra.mxu0 %v95_v54  ;;  %v209_v19 = vld [vmem:[#allocation8 + $0x1b0] sm:$0xff]  ;;  %v144_v20 = vld [vmem:[#allocation7 + $0x1a8] sm:$0xff]  ;;  %v143_v22 = vld [vmem:[#allocation7 + $0x1a0] sm:$0xff] }
  0x59   :  { %381 = vmatpush1.msra.mxu1 %v159_v55  ;;  %311 = vmatprep.subr.mxu0 %v94_v56  ;;  %v208_v21 = vld [vmem:[#allocation8 + $0x1a8] sm:$0xff]  ;;  %v207_v23 = vld [vmem:[#allocation8 + $0x1a0] sm:$0xff]  ;;  %v142_v24 = vld [vmem:[#allocation7 + $0x198] sm:$0xff] }
  0x5a   :  { %382 = vmatprep.subr.mxu1 %v158_v57  ;;  %312 = vmatpush1.msra.mxu0 %v93_v58  ;;  %v206_v25 = vld [vmem:[#allocation8 + $0x198] sm:$0xff]  ;;  %v141_v26 = vld [vmem:[#allocation7 + $0x190] sm:$0xff]  ;;  %v140_v28 = vld [vmem:[#allocation7 + $0x188] sm:$0xff] }
  0x5b   :  { %383 = vmatpush1.msra.mxu1 %v157_v59  ;;  %313 = vmatprep.subr.mxu0 %v92_v60  ;;  %v205_v27 = vld [vmem:[#allocation8 + $0x190] sm:$0xff]  ;;  %v204_v29 = vld [vmem:[#allocation8 + $0x188] sm:$0xff]  ;;  %v139_v30 = vld [vmem:[#allocation7 + $0x180] sm:$0xff] }
  0x5c   :  { %384 = vmatprep.subr.mxu1 %v156_v61  ;;  %314 = vmatpush1.msra.mxu0 %v91_v62  ;;  %v203_v31 = vld [vmem:[#allocation8 + $0x180] sm:$0xff]  ;;  %v138_v32 = vld [vmem:[#allocation7 + $0x178] sm:$0xff]  ;;  %v137_v34 = vld [vmem:[#allocation7 + $0x170] sm:$0xff] }
  0x5d   :  { %385 = vmatpush1.msra.mxu1 %v155_v63  ;;  %315 = vmatprep.subr.mxu0 %v154_v0  ;;  %v202_v33 = vld [vmem:[#allocation8 + $0x178] sm:$0xff]  ;;  %v201_v35 = vld [vmem:[#allocation8 + $0x170] sm:$0xff]  ;;  %v136_v36 = vld [vmem:[#allocation7 + $0x168] sm:$0xff] }
  0x5e   :  { %386 = vmatprep.subr.mxu1 %v218_v1  ;;  %316 = vmatpush2.msra.mxu0 %v153_v2  ;;  %v200_v37 = vld [vmem:[#allocation8 + $0x168] sm:$0xff]  ;;  %v135_v38 = vld [vmem:[#allocation7 + $0x160] sm:$0xff]  ;;  %v134_v40 = vld [vmem:[#allocation7 + $0x158] sm:$0xff] }
  0x5f   :  { %387 = vmatpush2.msra.mxu1 %v217_v3  ;;  %317 = vmatprep.subr.mxu0 %v152_v4  ;;  %v199_v39 = vld [vmem:[#allocation8 + $0x160] sm:$0xff]  ;;  %v198_v41 = vld [vmem:[#allocation8 + $0x158] sm:$0xff]  ;;  %v133_v42 = vld [vmem:[#allocation7 + $0x150] sm:$0xff] }
  0x60   :  { %388 = vmatprep.subr.mxu1 %v216_v5  ;;  %318 = vmatpush2.msra.mxu0 %v151_v6  ;;  %v197_v43 = vld [vmem:[#allocation8 + $0x150] sm:$0xff]  ;;  %v132_v44 = vld [vmem:[#allocation7 + $0x148] sm:$0xff]  ;;  %v131_v46 = vld [vmem:[#allocation7 + $0x140] sm:$0xff] }
  0x61   :  { %389 = vmatpush2.msra.mxu1 %v215_v7  ;;  %319 = vmatprep.subr.mxu0 %v150_v8  ;;  %v196_v45 = vld [vmem:[#allocation8 + $0x148] sm:$0xff]  ;;  %v195_v47 = vld [vmem:[#allocation8 + $0x140] sm:$0xff]  ;;  %v130_v48 = vld [vmem:[#allocation7 + $0x138] sm:$0xff] }
  0x62   :  { %390 = vmatprep.subr.mxu1 %v214_v9  ;;  %320 = vmatpush2.msra.mxu0 %v149_v10  ;;  %v194_v49 = vld [vmem:[#allocation8 + $0x138] sm:$0xff]  ;;  %v129_v50 = vld [vmem:[#allocation7 + $0x130] sm:$0xff]  ;;  %v128_v52 = vld [vmem:[#allocation7 + $0x128] sm:$0xff] }
  0x63   :  { %391 = vmatpush2.msra.mxu1 %v213_v11  ;;  %321 = vmatprep.subr.mxu0 %v148_v12  ;;  %v193_v51 = vld [vmem:[#allocation8 + $0x130] sm:$0xff]  ;;  %v192_v53 = vld [vmem:[#allocation8 + $0x128] sm:$0xff]  ;;  %v127_v54 = vld [vmem:[#allocation7 + $0x120] sm:$0xff] }
  0x64   :  { %392 = vmatprep.subr.mxu1 %v212_v13  ;;  %322 = vmatpush2.msra.mxu0 %v147_v14  ;;  %v191_v55 = vld [vmem:[#allocation8 + $0x120] sm:$0xff]  ;;  %v126_v56 = vld [vmem:[#allocation7 + $0x118] sm:$0xff]  ;;  %v125_v58 = vld [vmem:[#allocation7 + $0x110] sm:$0xff] }
  0x65   :  { %393 = vmatpush2.msra.mxu1 %v211_v15  ;;  %323 = vmatprep.subr.mxu0 %v146_v16  ;;  %v190_v57 = vld [vmem:[#allocation8 + $0x118] sm:$0xff]  ;;  %v189_v59 = vld [vmem:[#allocation8 + $0x110] sm:$0xff]  ;;  %v124_v60 = vld [vmem:[#allocation7 + $0x108] sm:$0xff] }
  0x66   :  { %394 = vmatprep.subr.mxu1 %v210_v17  ;;  %324 = vmatpush2.msra.mxu0 %v145_v18  ;;  %v188_v61 = vld [vmem:[#allocation8 + $0x108] sm:$0xff]  ;;  %v123_v62 = vld [vmem:[#allocation7 + $0x100] sm:$0xff]  ;;  %v88_v1 = vld [vmem:[#allocation5 + $0x8] sm:$0xff] }
  0x67   :  { %395 = vmatpush2.msra.mxu1 %v209_v19  ;;  %325 = vmatprep.subr.mxu0 %v144_v20  ;;  %v86_v63 = vld [vmem:[#allocation2 + $0x8] sm:$0xff]  ;;  %v187_v0 = vld [vmem:[#allocation8 + $0x100] sm:$0xff]  ;;  %v727_v4 = vld [vmem:[#allocation5] sm:$0xff] }
  0x68   :  { %396 = vmatprep.subr.mxu1 %v208_v21  ;;  %326 = vmatpush2.msra.mxu0 %v143_v22  ;;  %v90_v2 = vadd.f32 %v88_v1, %v86_v63  ;;  %v725_v3 = vld [vmem:[#allocation2] sm:$0xff]  ;;  %v250_v5 = vld [vmem:[#allocation10 + $0xf8] sm:$0xff]  ;;  %v249_v6 = vld [vmem:[#allocation10 + $0xf0] sm:$0xff] }
  0x69   :  { %397 = vmatpush2.msra.mxu1 %v207_v23  ;;  %327 = vmatprep.subr.mxu0 %v142_v24  ;;  %v248_v7 = vld [vmem:[#allocation10 + $0xe8] sm:$0xff]  ;;  %v247_v8 = vld [vmem:[#allocation10 + $0xe0] sm:$0xff]  ;;  %v246_v9 = vld [vmem:[#allocation10 + $0xd8] sm:$0xff] }
  0x6a   :  { %398 = vmatprep.subr.mxu1 %v206_v25  ;;  %328 = vmatpush2.msra.mxu0 %v141_v26  ;;  %v245_v10 = vld [vmem:[#allocation10 + $0xd0] sm:$0xff]  ;;  %v244_v11 = vld [vmem:[#allocation10 + $0xc8] sm:$0xff]  ;;  %v243_v12 = vld [vmem:[#allocation10 + $0xc0] sm:$0xff] }
  0x6b   :  { %399 = vmatpush2.msra.mxu1 %v205_v27  ;;  %329 = vmatprep.subr.mxu0 %v140_v28  ;;  %v242_v13 = vld [vmem:[#allocation10 + $0xb8] sm:$0xff]  ;;  %v241_v14 = vld [vmem:[#allocation10 + $0xb0] sm:$0xff]  ;;  %v240_v15 = vld [vmem:[#allocation10 + $0xa8] sm:$0xff] }
  0x6c   :  { %400 = vmatprep.subr.mxu1 %v204_v29  ;;  %330 = vmatpush2.msra.mxu0 %v139_v30  ;;  %v239_v16 = vld [vmem:[#allocation10 + $0xa0] sm:$0xff]  ;;  %v238_v17 = vld [vmem:[#allocation10 + $0x98] sm:$0xff]  ;;  %v237_v18 = vld [vmem:[#allocation10 + $0x90] sm:$0xff] }
  0x6d   :  { %401 = vmatpush2.msra.mxu1 %v203_v31  ;;  %331 = vmatprep.subr.mxu0 %v138_v32  ;;  %v236_v19 = vld [vmem:[#allocation10 + $0x88] sm:$0xff]  ;;  %v235_v20 = vld [vmem:[#allocation10 + $0x80] sm:$0xff]  ;;  %v234_v21 = vld [vmem:[#allocation10 + $0x78] sm:$0xff] }
  0x6e   :  { %402 = vmatprep.subr.mxu1 %v202_v33  ;;  %332 = vmatpush2.msra.mxu0 %v137_v34  ;;  %v233_v22 = vld [vmem:[#allocation10 + $0x70] sm:$0xff]  ;;  %v232_v23 = vld [vmem:[#allocation10 + $0x68] sm:$0xff]  ;;  %v231_v24 = vld [vmem:[#allocation10 + $0x60] sm:$0xff] }
  0x6f   :  { %403 = vmatpush2.msra.mxu1 %v201_v35  ;;  %333 = vmatprep.subr.mxu0 %v136_v36  ;;  %v230_v25 = vld [vmem:[#allocation10 + $0x58] sm:$0xff]  ;;  %v229_v26 = vld [vmem:[#allocation10 + $0x50] sm:$0xff]  ;;  %v228_v27 = vld [vmem:[#allocation10 + $0x48] sm:$0xff] }
  0x70   :  { %404 = vmatprep.subr.mxu1 %v200_v37  ;;  %334 = vmatpush2.msra.mxu0 %v135_v38  ;;  %v227_v28 = vld [vmem:[#allocation10 + $0x40] sm:$0xff]  ;;  %v226_v29 = vld [vmem:[#allocation10 + $0x38] sm:$0xff]  ;;  %v225_v30 = vld [vmem:[#allocation10 + $0x30] sm:$0xff] }
  0x71   :  { %405 = vmatpush2.msra.mxu1 %v199_v39  ;;  %335 = vmatprep.subr.mxu0 %v134_v40  ;;  %v224_v31 = vld [vmem:[#allocation10 + $0x28] sm:$0xff]  ;;  %v223_v32 = vld [vmem:[#allocation10 + $0x20] sm:$0xff]  ;;  %v222_v33 = vld [vmem:[#allocation10 + $0x18] sm:$0xff] }
  0x72   :  { %406 = vmatprep.subr.mxu1 %v198_v41  ;;  %336 = vmatpush2.msra.mxu0 %v133_v42  ;;  %v221_v34 = vld [vmem:[#allocation10 + $0x10] sm:$0xff]  ;;  %v220_v35 = vld [vmem:[#allocation10 + $0x8] sm:$0xff]  ;;  %v219_v36 = vld [vmem:[#allocation10] sm:$0xff] }
  0x73   :  { %407 = vmatpush2.msra.mxu1 %v197_v43  ;;  %337 = vmatprep.subr.mxu0 %v132_v44  ;;  %v282_v37 = vld [vmem:[#allocation10 + $0x1f8] sm:$0xff]  ;;  %v281_v38 = vld [vmem:[#allocation10 + $0x1f0] sm:$0xff]  ;;  %v280_v39 = vld [vmem:[#allocation10 + $0x1e8] sm:$0xff] }
  0x74   :  { %408 = vmatprep.subr.mxu1 %v196_v45  ;;  %338 = vmatpush2.msra.mxu0 %v131_v46  ;;  %v279_v40 = vld [vmem:[#allocation10 + $0x1e0] sm:$0xff]  ;;  %v278_v41 = vld [vmem:[#allocation10 + $0x1d8] sm:$0xff]  ;;  %v277_v42 = vld [vmem:[#allocation10 + $0x1d0] sm:$0xff] }
  0x75   :  { %409 = vmatpush2.msra.mxu1 %v195_v47  ;;  %339 = vmatprep.subr.mxu0 %v130_v48  ;;  %v276_v43 = vld [vmem:[#allocation10 + $0x1c8] sm:$0xff]  ;;  %v275_v44 = vld [vmem:[#allocation10 + $0x1c0] sm:$0xff]  ;;  %v274_v45 = vld [vmem:[#allocation10 + $0x1b8] sm:$0xff] }
  0x76   :  { %410 = vmatprep.subr.mxu1 %v194_v49  ;;  %340 = vmatpush2.msra.mxu0 %v129_v50  ;;  %v273_v46 = vld [vmem:[#allocation10 + $0x1b0] sm:$0xff]  ;;  %v272_v47 = vld [vmem:[#allocation10 + $0x1a8] sm:$0xff]  ;;  %v271_v48 = vld [vmem:[#allocation10 + $0x1a0] sm:$0xff] }
  0x77   :  { %411 = vmatpush2.msra.mxu1 %v193_v51  ;;  %341 = vmatprep.subr.mxu0 %v128_v52  ;;  %v270_v49 = vld [vmem:[#allocation10 + $0x198] sm:$0xff]  ;;  %v269_v50 = vld [vmem:[#allocation10 + $0x190] sm:$0xff]  ;;  %v268_v51 = vld [vmem:[#allocation10 + $0x188] sm:$0xff] }
  0x78   :  { %412 = vmatprep.subr.mxu1 %v192_v53  ;;  %342 = vmatpush2.msra.mxu0 %v127_v54  ;;  %v267_v52 = vld [vmem:[#allocation10 + $0x180] sm:$0xff]  ;;  %v266_v53 = vld [vmem:[#allocation10 + $0x178] sm:$0xff]  ;;  %v265_v54 = vld [vmem:[#allocation10 + $0x170] sm:$0xff] }
  0x79   :  { %413 = vmatpush2.msra.mxu1 %v191_v55  ;;  %343 = vmatprep.subr.mxu0 %v126_v56  ;;  %v264_v55 = vld [vmem:[#allocation10 + $0x168] sm:$0xff]  ;;  %v263_v56 = vld [vmem:[#allocation10 + $0x160] sm:$0xff] }
  0x7a   :  { %414 = vmatprep.subr.mxu1 %v190_v57  ;;  %344 = vmatpush2.msra.mxu0 %v125_v58  ;;  %v262_v57 = vld [vmem:[#allocation10 + $0x158] sm:$0xff]  ;;  %v261_v58 = vld [vmem:[#allocation10 + $0x150] sm:$0xff] }
  0x7b   :  { %415 = vmatpush2.msra.mxu1 %v189_v59  ;;  %345 = vmatprep.subr.mxu0 %v124_v60  ;;  %v260_v59 = vld [vmem:[#allocation10 + $0x148] sm:$0xff]  ;;  %v259_v60 = vld [vmem:[#allocation10 + $0x140] sm:$0xff] }
  0x7c   :  { %416 = vmatprep.subr.mxu1 %v188_v61  ;;  %346 = vmatpush2.msra.mxu0 %v123_v62  ;;  %v258_v61 = vld [vmem:[#allocation10 + $0x138] sm:$0xff]  ;;  %v257_v62 = vld [vmem:[#allocation10 + $0x130] sm:$0xff] }
  0x7d   :  { %347 = vmatprep.mubr.f32.mxu0 %v86_v63  ;;  %417 = vmatpush2.msra.mxu1 %v187_v0  ;;  %v256_v63 = vld [vmem:[#allocation10 + $0x128] sm:$0xff]  ;;  %v255_v0 = vld [vmem:[#allocation10 + $0x120] sm:$0xff] }
  0x7e   :  { %418 = vmatprep.mubr.f32.mxu1 %v88_v1  ;;  %348 = vmatmul.mubr.f32.vlgmr.msra.gmra.mxu0 %v725_v3  ;;  %v254_v1 = vld [vmem:[#allocation10 + $0x118] sm:$0xff] }
  0x7f   :  { %419 = vmatmul.mubr.f32.vlgmr.msra.gmra.mxu1 %v727_v4  ;;  %425 = vmatprep.subr.mxu0 %v250_v5  ;;  %v252_v5 = vld [vmem:[#allocation10 + $0x108] sm:$0xff] }
  0x80   :  { %489 = vmatprep.mubr.f32.mxu0 %v90_v2  ;;  %426 = vmatpush1.msra.mxu0 %v249_v6  ;;  %v253_v2 = vld [vmem:[#allocation10 + $0x110] sm:$0xff]  ;;  %v89_v6 = vadd.f32 %v727_v4, %v725_v3 }
  0x81   :  { %427 = vmatprep.subr.mxu0 %v248_v7  ;;  %v251_v7 = vld [vmem:[#allocation10 + $0x100] sm:$0xff] }
  0x82   :  { %428 = vmatpush1.msra.mxu0 %v247_v8 }
  0x83   :  { %429 = vmatprep.subr.mxu0 %v246_v9 }
  0x84   :  { %430 = vmatpush1.msra.mxu0 %v245_v10 }
  0x85   :  { %431 = vmatprep.subr.mxu0 %v244_v11 }
  0x86   :  { %432 = vmatpush1.msra.mxu0 %v243_v12 }
  0x87   :  { %433 = vmatprep.subr.mxu0 %v242_v13 }
  0x88   :  { %434 = vmatpush1.msra.mxu0 %v241_v14 }
  0x89   :  { %435 = vmatprep.subr.mxu0 %v240_v15 }
  0x8a   :  { %436 = vmatpush1.msra.mxu0 %v239_v16 }
  0x8b   :  { %437 = vmatprep.subr.mxu0 %v238_v17 }
  0x8c   :  { %438 = vmatpush1.msra.mxu0 %v237_v18 }
  0x8d   :  { %439 = vmatprep.subr.mxu0 %v236_v19 }
  0x8e   :  { %440 = vmatpush1.msra.mxu0 %v235_v20 }
  0x8f   :  { %441 = vmatprep.subr.mxu0 %v234_v21 }
  0x90   :  { %442 = vmatpush1.msra.mxu0 %v233_v22 }
  0x91   :  { %443 = vmatprep.subr.mxu0 %v232_v23 }
  0x92   :  { %444 = vmatpush1.msra.mxu0 %v231_v24 }
  0x93   :  { %445 = vmatprep.subr.mxu0 %v230_v25 }
  0x94   :  { %446 = vmatpush1.msra.mxu0 %v229_v26 }
  0x95   :  { %447 = vmatprep.subr.mxu0 %v228_v27 }
  0x96   :  { %448 = vmatpush1.msra.mxu0 %v227_v28 }
  0x97   :  { %449 = vmatprep.subr.mxu0 %v226_v29 }
  0x98   :  { %450 = vmatpush1.msra.mxu0 %v225_v30 }
  0x99   :  { %451 = vmatprep.subr.mxu0 %v224_v31 }
  0x9a   :  { %452 = vmatpush1.msra.mxu0 %v223_v32 }
  0x9b   :  { %453 = vmatprep.subr.mxu0 %v222_v33 }
  0x9c   :  { %454 = vmatpush1.msra.mxu0 %v221_v34 }
  0x9d   :  { %455 = vmatprep.subr.mxu0 %v220_v35 }
  0x9e   :  { %456 = vmatpush1.msra.mxu0 %v219_v36 }
  0x9f   :  { %457 = vmatprep.subr.mxu0 %v282_v37 }
  0xa0   :  { %458 = vmatpush2.msra.mxu0 %v281_v38 }
  0xa1   :  { %459 = vmatprep.subr.mxu0 %v280_v39 }
  0xa2   :  { %460 = vmatpush2.msra.mxu0 %v279_v40 }
  0xa3   :  { %461 = vmatprep.subr.mxu0 %v278_v41 }
  0xa4   :  { %462 = vmatpush2.msra.mxu0 %v277_v42 }
  0xa5   :  { %463 = vmatprep.subr.mxu0 %v276_v43 }
  0xa6   :  { %464 = vmatpush2.msra.mxu0 %v275_v44 }
  0xa7   :  { %465 = vmatprep.subr.mxu0 %v274_v45 }
  0xa8   :  { %466 = vmatpush2.msra.mxu0 %v273_v46 }
  0xa9   :  { %467 = vmatprep.subr.mxu0 %v272_v47 }
  0xaa   :  { %468 = vmatpush2.msra.mxu0 %v271_v48 }
  0xab   :  { %469 = vmatprep.subr.mxu0 %v270_v49 }
  0xac   :  { %470 = vmatpush2.msra.mxu0 %v269_v50 }
  0xad   :  { %471 = vmatprep.subr.mxu0 %v268_v51 }
  0xae   :  { %472 = vmatpush2.msra.mxu0 %v267_v52 }
  0xaf   :  { %473 = vmatprep.subr.mxu0 %v266_v53 }
  0xb0   :  { %474 = vmatpush2.msra.mxu0 %v265_v54 }
  0xb1   :  { %475 = vmatprep.subr.mxu0 %v264_v55 }
  0xb2   :  { %476 = vmatpush2.msra.mxu0 %v263_v56 }
  0xb3   :  { %477 = vmatprep.subr.mxu0 %v262_v57 }
  0xb4   :  { %478 = vmatpush2.msra.mxu0 %v261_v58 }
  0xb5   :  { %479 = vmatprep.subr.mxu0 %v260_v59 }
  0xb6   :  { %480 = vmatpush2.msra.mxu0 %v259_v60 }
  0xb7   :  { %481 = vmatprep.subr.mxu0 %v258_v61 }
  0xb8   :  { %482 = vmatpush2.msra.mxu0 %v257_v62 }
  0xb9   :  { %483 = vmatprep.subr.mxu0 %v256_v63 }
  0xba   :  { %484 = vmatpush2.msra.mxu0 %v255_v0 }
  0xbb   :  { %485 = vmatprep.subr.mxu0 %v254_v1 }
  0xbc   :  { %486 = vmatpush2.msra.mxu0 %v253_v2 }
  0xbd   :  { %487 = vmatprep.subr.mxu0 %v252_v5 }
  0xbe   :  { %488 = vmatpush2.msra.mxu0 %v251_v7 }
  0xbf   :  { %490 = vmatmul.mubr.f32.vlgmr.msra.gmra.mxu0 %v89_v6 }
 0x13e   :  { %v349_v8 = vpop.f32.mrf.mxu0 }
 0x13f   :  { %v420_v9 = vpop.f32.mrf.mxu1 }
 0x140   :  { %v351_v10 = vpop.f32.mrf.mxu0  ;;  %v496_v13 = vsub.f32 %v349_v8, %v420_v9 }
 0x141   :  { %v422_v11 = vpop.f32.mrf.mxu1 }
 0x142   :  { %v497_v16 = vsub.f32 %v351_v10, %v422_v11  ;;  %v502_v19 = vmul.f32 %v496_v13, %v496_v13 }
 0x144   :  { %v503_v4 = vmul.f32 %v497_v16, %v497_v16 }
 0x17f   :  { %v491_v12 = vpop.f32.mrf.mxu0 }
 0x180   :  { %v498_v14 = vsub.f32 %v491_v12, %v349_v8 }
 0x181   :  { %v493_v15 = vpop.f32.mrf.mxu0 }
 0x182   :  { %v500_v17 = vsub.f32 %v498_v14, %v420_v9  ;;  %v499_v18 = vsub.f32 %v493_v15, %v351_v10 }
 0x184   :  { %v504_v20 = vmul.f32 %v500_v17, %v500_v17  ;;  %v501_v3 = vsub.f32 %v499_v18, %v422_v11 }
 0x186   :  { %v506_v21 = vadd.f32 %v504_v20, %v502_v19  ;;  %v505_v22 = vmul.f32 %v501_v3, %v501_v3 }
 0x188   :  { %508 = vst [vmem:[#allocation11] sm:$0xff] %v506_v21  ;;  %v507_v23 = vadd.f32 %v505_v22, %v503_v4 }
 0x18a   :  { %509 = vst [vmem:[#allocation11 + $0x8] sm:$0xff] %v507_v23 }
 0x18b   :  { %646 = shalt.err (!%p643_p1)
}
 0x18c   :  { %519 = dma.vmem_to_hbm [thread:$0]  %s517_s4, 256, %s741_s5, [#allocation4]  }
 0x18d   :  { %661 = dma.done.wait [#allocation4], 256  }
 0x18e   :  { %662 = vsyncadd [#allocation4], 4294967040 }
 0x18f   :  { %523 = vsyncpa [#allocation3], 1 }
 0x190   :  { %524 = vsyncpa [#allocation6], 1 }
 0x191   :  { %525 = vsyncpa [#allocation9], 1 }
 0x192   :  { %526 = vsyncpa [#allocation4], 1 }

</bundles_post_ra>
